<compile_context>
chip_gen: v7x
topology: tpu7x:2x2x1
jax: 0.10.0
libtpu: 0.0.40
codegen_flags: <defaults>
</compile_context>

<pallas_src>
import jax
import jax.numpy as jnp
from jax.experimental import pallas as pl
from jax.experimental.pallas import tpu as pltpu

LANES = 128      # vreg lane width
SUBLANES = 8     # vreg sublane count (f32)
HIDDEN = 8       # fixed hidden width of MyNetwork


def _round_up(x, m):
    return ((x + m - 1) // m) * m


def _mlp_kernel(x_ref, w1_ref, b1_ref, w2_ref, b2_ref, o_ref):
    # Layer 1: Linear(input_size -> 8) + ReLU (MXU matmul, f32 accumulate).
    h = jnp.dot(x_ref[...], w1_ref[...], preferred_element_type=jnp.float32)
    h = jnp.maximum(h + b1_ref[...], 0.0)          # b1 is (1, 8), broadcasts over batch
    # Layer 2: MXU pass against the lane-dense (8, 128) zero-padded w2 kept
    # resident in VMEM; only the real out_size columns are biased and stored,
    # so HBM writeback stays narrow (the padded lanes never leave vregs).
    out_full = jnp.dot(h, w2_ref[...], preferred_element_type=jnp.float32)
    out_size = o_ref.shape[-1]
    o_ref[...] = (out_full[:, :out_size] + b2_ref[...]).astype(o_ref.dtype)
    # NOTE: when B is not a multiple of the batch tile, the last block's extra
    # rows are garbage — they are masked on this store and never read back.


def my_network_forward(x, w1, b1, w2, b2, *, block_batch=8192):
    """x: (B, input_size); w1: (input_size, 8); b1: (8,);
    w2: (8, output_size); b2: (output_size,).  Returns (B, output_size)."""
    B, in_size = x.shape
    hidden = w1.shape[1]
    out_size = w2.shape[1]
    dtype = x.dtype

    # Resident weight operands.  w2 is zero-padded to 128 lanes ONLY as an MXU
    # operand (4 KiB of VMEM); output / bias stay at the real out_size.
    w2_p = jnp.zeros((hidden, LANES), dtype).at[:, :out_size].set(w2.astype(dtype))
    b2_2d = b2.reshape(1, out_size).astype(dtype)
    b1_2d = b1.reshape(1, hidden).astype(dtype)

    # Batch tile: as large as useful, multiple of 8 sublanes, and (when B allows)
    # small enough that the grid has >=2 steps so v7x's two TensorCores can split
    # the "parallel" batch axis.  No wrapper padding — ragged last block is fine.
    tb = min(block_batch, _round_up(max(pl.cdiv(B, 2), 1), SUBLANES))
    tb = max(tb, SUBLANES)
    grid = (pl.cdiv(B, tb),)

    # Explicit scoped-VMEM budget: double-buffered x/out tiles + resident weights
    # + slack, clamped to [16 MiB, 48 MiB] (48 MiB leaves headroom on v7x's
    # 64 MiB physical VMEM; the floor lifts v5e's 16 MiB scoped default).
    bytes_per = jnp.dtype(dtype).itemsize
    x_tile_bytes = tb * in_size * bytes_per
    out_tile_bytes = tb * out_size * bytes_per
    weight_bytes = (in_size * hidden + hidden + hidden * LANES + out_size) * bytes_per
    needed = 2 * (x_tile_bytes + out_tile_bytes) + weight_bytes + (2 << 20)
    vmem_limit = int(min(48 << 20, max(16 << 20, needed)))

    out = pl.pallas_call(
        _mlp_kernel,
        out_shape=jax.ShapeDtypeStruct((B, out_size), dtype),
        grid=grid,
        in_specs=[
            pl.BlockSpec((tb, in_size), lambda i: (i, 0)),       # x: tiled over batch
            pl.BlockSpec((in_size, hidden), lambda i: (0, 0)),   # w1: resident
            pl.BlockSpec((1, hidden), lambda i: (0, 0)),         # b1: resident
            pl.BlockSpec((hidden, LANES), lambda i: (0, 0)),     # w2 (lane-padded): resident
            pl.BlockSpec((1, out_size), lambda i: (0, 0)),       # b2: resident
        ],
        out_specs=pl.BlockSpec((tb, out_size), lambda i: (i, 0)),
        compiler_params=pltpu.CompilerParams(
            dimension_semantics=("parallel",),    # megacore / v7x 2-TC split over batch
            vmem_limit_bytes=vmem_limit,
        ),
    )(x, w1.astype(dtype), b1_2d, w2_p, b2_2d)

    return out


def init_params(key, input_size, output_size, dtype=jnp.float32):
    """Deterministic init matching nn.Linear's default U(-1/sqrt(fan_in), 1/sqrt(fan_in))."""
    k1, k2, k3, k4 = jax.random.split(key, 4)
    bound1 = 1.0 / jnp.sqrt(jnp.float32(input_size))
    bound2 = 1.0 / jnp.sqrt(jnp.float32(HIDDEN))
    w1 = jax.random.uniform(k1, (input_size, HIDDEN), dtype, -bound1, bound1)
    b1 = jax.random.uniform(k2, (HIDDEN,), dtype, -bound1, bound1)
    w2 = jax.random.uniform(k3, (HIDDEN, output_size), dtype, -bound2, bound2)
    b2 = jax.random.uniform(k4, (output_size,), dtype, -bound2, bound2)
    return w1, b1, w2, b2


if __name__ == "__main__":
    input_size = 32
    output_size = 4
    batch = 8

    key = jax.random.PRNGKey(0)
    kx, kp = jax.random.split(key)
    x = jax.random.normal(kx, (batch, input_size), jnp.float32)
    w1, b1, w2, b2 = init_params(kp, input_size, output_size)

    out = my_network_forward(x, w1, b1, w2, b2)
    out = jax.block_until_ready(out)

    # Reference check in plain JAX (same math as the PyTorch module).
    ref = jnp.maximum(x @ w1 + b1, 0.0) @ w2 + b2
    assert out.shape == (batch, output_size)
    assert jnp.allclose(out, ref, atol=1e-5, rtol=1e-5)

    # Also exercise the multi-step grid + ragged last block (B not a tile multiple).
    big_b = 1037
    xb = jax.random.normal(kx, (big_b, input_size), jnp.float32)
    out_b = jax.block_until_ready(my_network_forward(xb, w1, b1, w2, b2))
    ref_b = jnp.maximum(xb @ w1 + b1, 0.0) @ w2 + b2
    assert out_b.shape == (big_b, output_size)
    assert jnp.allclose(out_b, ref_b, atol=1e-5, rtol=1e-5)

    print("KERNEL_OK")
</pallas_src>

<mosaic_0001>
module attributes {stable_mosaic.version = 11 : i64} {
  func.func @_mlp_kernel(%arg0: i32, %arg1: memref<8x32xf32, #tpu.memory_space<vmem>>, %arg2: memref<32x8xf32, #tpu.memory_space<vmem>>, %arg3: memref<1x8xf32, #tpu.memory_space<vmem>>, %arg4: memref<8x128xf32, #tpu.memory_space<vmem>>, %arg5: memref<1x4xf32, #tpu.memory_space<vmem>>, %arg6: memref<8x4xf32, #tpu.memory_space<vmem>>) attributes {dimension_semantics = [#tpu.dimension_semantics<parallel>], iteration_bounds = array<i64: 1>, scalar_prefetch = 0 : i64, scratch_operands = 0 : i64, tpu.core_type = #tpu.core_type<tc>, window_params = [{transform_indices = @transform_0, window_bounds = array<i64: 8, 32>}, {pipeline_mode = #tpu.pipeline_mode<synchronous>, transform_indices = @transform_1, window_bounds = array<i64: 32, 8>}, {pipeline_mode = #tpu.pipeline_mode<synchronous>, transform_indices = @transform_2, window_bounds = array<i64: 1, 8>}, {pipeline_mode = #tpu.pipeline_mode<synchronous>, transform_indices = @transform_3, window_bounds = array<i64: 8, 128>}, {pipeline_mode = #tpu.pipeline_mode<synchronous>, transform_indices = @transform_4, window_bounds = array<i64: 1, 4>}, {transform_indices = @transform_5, window_bounds = array<i64: 8, 4>}]} {
    %c0 = arith.constant 0 : index
    %c0_0 = arith.constant 0 : index
    %0 = vector.load %arg1[%c0, %c0_0] : memref<8x32xf32, #tpu.memory_space<vmem>>, vector<8x32xf32>
    %c0_1 = arith.constant 0 : index
    %c0_2 = arith.constant 0 : index
    %1 = vector.load %arg2[%c0_1, %c0_2] : memref<32x8xf32, #tpu.memory_space<vmem>>, vector<32x8xf32>
    %cst = arith.constant dense<0.000000e+00> : vector<8x8xf32>
    %2 = tpu.matmul %0, %1, %cst {dimension_numbers = #tpu.dot_dimension_numbers<[1], [0], [0], [1], [0, 0, 1, 1], [], []>} : vector<8x32xf32>, vector<32x8xf32>, vector<8x8xf32> -> vector<8x8xf32>
    %c0_3 = arith.constant 0 : index
    %c0_4 = arith.constant 0 : index
    %3 = vector.load %arg3[%c0_3, %c0_4] : memref<1x8xf32, #tpu.memory_space<vmem>>, vector<1x8xf32>
    %4 = vector.broadcast %3 : vector<1x8xf32> to vector<8x8xf32>
    %5 = arith.addf %2, %4 : vector<8x8xf32>
    %cst_5 = arith.constant 0.000000e+00 : f32
    %6 = vector.broadcast %cst_5 : f32 to vector<8x8xf32>
    %7 = arith.maximumf %5, %6 : vector<8x8xf32>
    %c0_6 = arith.constant 0 : index
    %c0_7 = arith.constant 0 : index
    %8 = vector.load %arg4[%c0_6, %c0_7] : memref<8x128xf32, #tpu.memory_space<vmem>>, vector<8x128xf32>
    %cst_8 = arith.constant dense<0.000000e+00> : vector<8x128xf32>
    %9 = tpu.matmul %7, %8, %cst_8 {dimension_numbers = #tpu.dot_dimension_numbers<[1], [0], [0], [1], [0, 0, 1, 1], [], []>} : vector<8x8xf32>, vector<8x128xf32>, vector<8x128xf32> -> vector<8x128xf32>
    %10 = vector.extract_strided_slice %9 {offsets = [0, 0], sizes = [8, 4], strides = [1, 1]} : vector<8x128xf32> to vector<8x4xf32>
    %c0_9 = arith.constant 0 : index
    %c0_10 = arith.constant 0 : index
    %11 = vector.load %arg5[%c0_9, %c0_10] : memref<1x4xf32, #tpu.memory_space<vmem>>, vector<1x4xf32>
    %12 = vector.broadcast %11 : vector<1x4xf32> to vector<8x4xf32>
    %13 = arith.addf %10, %12 : vector<8x4xf32>
    %c0_11 = arith.constant 0 : index
    %c0_12 = arith.constant 0 : index
    %14 = vector.load %arg6[%c0_11, %c0_12] : memref<8x4xf32, #tpu.memory_space<vmem>>, vector<8x4xf32>
    tpu.vector_store %arg6[%c0_11, %c0_12], %13 {strides = array<i32>} : memref<8x4xf32, #tpu.memory_space<vmem>>, vector<8x4xf32>,
    return
  }
  func.func @transform_0(%arg0: i32) -> (i32, i32) {
    %c0_i32 = arith.constant 0 : i32
    %c0_i32_0 = arith.constant 0 : i32
    return %arg0, %c0_i32 : i32, i32
  }
  func.func @transform_1(%arg0: i32) -> (i32, i32) {
    %c0_i32 = arith.constant 0 : i32
    %c0_i32_0 = arith.constant 0 : i32
    %c0_i32_1 = arith.constant 0 : i32
    return %c0_i32, %c0_i32_0 : i32, i32
  }
  func.func @transform_2(%arg0: i32) -> (i32, i32) {
    %c0_i32 = arith.constant 0 : i32
    %c0_i32_0 = arith.constant 0 : i32
    %c0_i32_1 = arith.constant 0 : i32
    return %c0_i32, %c0_i32_0 : i32, i32
  }
  func.func @transform_3(%arg0: i32) -> (i32, i32) {
    %c0_i32 = arith.constant 0 : i32
    %c0_i32_0 = arith.constant 0 : i32
    %c0_i32_1 = arith.constant 0 : i32
    return %c0_i32, %c0_i32_0 : i32, i32
  }
  func.func @transform_4(%arg0: i32) -> (i32, i32) {
    %c0_i32 = arith.constant 0 : i32
    %c0_i32_0 = arith.constant 0 : i32
    %c0_i32_1 = arith.constant 0 : i32
    return %c0_i32, %c0_i32_0 : i32, i32
  }
  func.func @transform_5(%arg0: i32) -> (i32, i32) {
    %c0_i32 = arith.constant 0 : i32
    %c0_i32_0 = arith.constant 0 : i32
    return %arg0, %c0_i32 : i32, i32
  }
}

</mosaic_0001>

<bundles_post_ra>
// kernel: tpu_custom_call.1
= control target key start
LH: loop header
LB: loop body
LE: loop exit
PB: predicated region body
PF: predicated region fallthrough
CT: control target
= control target key end

     0   :  { %v232_v0 = vmov 0.0|0.0   ;;  %vm233_vm0 = vmmov 0   ;;  %v234_v4 = vmov 0.0   ;;  %vm32_vm1 = vcmask 261120   ;;  %s292_s1 = inlined_call_operand.vmem [shape: f32[32,8], index: 1, kind: input, shape index: {}]   ;;  %s293_s0 = inlined_call_operand.vmem [shape: f32[8,32], index: 0, kind: input, shape index: {}]   ;;  %s294_s3 = inlined_call_operand.vmem [shape: f32[8,128], index: 3, kind: input, shape index: {}]   ;;  %s295_s2 = inlined_call_operand.vmem [shape: f32[1,8], index: 2, kind: input, shape index: {}]   ;;  %s296_s4 = inlined_call_operand.vmem [shape: f32[1,4], index: 4, kind: input, shape index: {}]   ;;  %s297_s5 = inlined_call_operand.vmem [shape: f32[8,4], index: 5, kind: output, shape index: {}]  }
   0x1   :  { %223 = vmatprep.subr.bf16.mxu0 %v232_v0  ;;  %v21_v1 = vld [vmem:[%s292_s1] sm:$0xff]  ;;  %v22_v2 = vld [vmem:[%s292_s1 + $0x8] sm:$0xff]  ;;  %v23_v3 = vld [vmem:[%s292_s1 + $0x10] sm:$0xff]  ;;  %215 = vmatprep.mubr.msk.f32.mxu0 %vm233_vm0, %v234_v4  ;;  %vm108_vm2 = vcmask 64512   ;;  %vm190_vm3 = vcmask 31744  }
   0x2   :  { %v224_v5 = vpack.c.bf16 %v22_v2, %v21_v1  ;;  %v24_v6 = vld [vmem:[%s292_s1 + $0x18] sm:$0xff]  ;;  %218 = vmatprep.subr.mxu1 %v234_v4  ;;  %220 = vmatprep.mubr.msk.f32.mxu1 %vm233_vm0, %v234_v4  ;;  %v20_v8 = vld [vmem:[%s293_s0] sm:$0xff] }
   0x3   :  { %v227_v7 = vpack.c.bf16 %v24_v6, %v23_v3  ;;  %v107_v9 = vld [vmem:[%s294_s3] sm:$0xff] }
   0x4   :  { %225 = vmatpush3.bf16.msra.mxu0 %v224_v5  ;;  %219 = vmatpush3.msra.mxu1 %v107_v9  ;;  %v196_v10 = vld [vmem:[%s295_s2] ss:$0 sm:$0xff] }
   0x5   :  { %226 = vmatprep.subr.bf16.mxu0 %v232_v0  ;;  %v199_v15 = vld [vmem:[%s296_s4] ss:$0 sm:$0xff] }
   0x8   :  { %228 = vmatpush3.bf16.msra.mxu0 %v227_v7 }
   0xb   :  { %216 = vmatmul.mubr.msk.f32.vlgmr.msra.gmra.mrb[0].mxu0 %vm32_vm1, %v20_v8 }
  0xde   :  { %v102_v11 = vpop.f32.mrb[0].mxu0 }
  0xdf   :  { %v103_v12 = vadd.f32 %v196_v10, %v102_v11  ;;  %v217_v13 = vpop.f32.mrb[1].mxu0 }
  0xe1   :  { %v106_v14 = vmax.f32 %v103_v12, 0.0 }
  0xe3   :  { %221 = vmatmul.mubr.msk.f32.vlgmr.msra.gmra.mrb[0].mxu1 %vm108_vm2, %v106_v14 }
 0x1b6   :  { %v178_v16 = vpop.f32.mrb[0].mxu1 }
 0x1b7   :  { %v189_v17 = vadd.f32 %v199_v15, %v178_v16  ;;  %v222_v18 = vpop.f32.mrb[1].mxu1 }
 0x1b9   :  { %191 = vst.msk [vmem:[%s297_s5] sm:$0xff] %vm190_vm3, %v189_v17 }

</bundles_post_ra>
